<compile_context>
chip_gen: v5e
topology: v5e:2x2
jax: 0.10.0
libtpu: 0.0.40
codegen_flags: <defaults>
</compile_context>

<pallas_src>
import jax
import jax.numpy as jnp
from jax.experimental import pallas as pl
from jax.experimental.pallas import tpu as pltpu

LANE = 128  # one 128-wide lane slot per GRU gate / head block


# --------------------------------------------------------------------------- #
# Kernel
# --------------------------------------------------------------------------- #
def rl3c_kernel(lhs_ref, hpad_ref, zg_ref, zm_ref,
                rhs_gru_ref, bi_ref, bh_ref,
                rhs_head_ref, bo_ref,
                out_ref, hnew_ref):
    # --- ProbabilisticGRUCell: one fused block-diagonal MXU call -------------
    # Output columns: 12 lane slots of 128 =
    #   [gi_mean r|z|n, gi_var r|z|n, gh_mean r|z|n, gh_var r|z|n]
    g = jnp.dot(lhs_ref[...], rhs_gru_ref[...],
                preferred_element_type=jnp.float32)            # (B, 12*128)

    W = 3 * LANE
    gi_m = g[:, 0 * W:1 * W] + bi_ref[...]                     # (B, 384)
    gi_v = g[:, 1 * W:2 * W]
    gh_m = g[:, 2 * W:3 * W] + bh_ref[...]
    gh_v = g[:, 3 * W:4 * W]

    gate = lambda a, k: a[:, k * LANE:(k + 1) * LANE]          # whole-vreg slice
    zg = zg_ref[...]
    zr, zz, zn = gate(zg, 0), gate(zg, 1), gate(zg, 2)

    r = jax.nn.sigmoid(gate(gi_m, 0) + gate(gh_m, 0)
                       + jnp.sqrt(gate(gi_v, 0) + gate(gh_v, 0)) * zr)
    z = jax.nn.sigmoid(gate(gi_m, 1) + gate(gh_m, 1)
                       + jnp.sqrt(gate(gi_v, 1) + gate(gh_v, 1)) * zz)
    n = jnp.tanh(gate(gi_m, 2) + r * gate(gh_m, 2)
                 + jnp.sqrt(gate(gi_v, 2) + r * r * gate(gh_v, 2)) * zn)
    h_new = (1.0 - z) * n + z * hpad_ref[...]                  # (B, 128), pad lanes == 0

    # --- LinearGaussian head: one fused block-diagonal MXU call --------------
    lhs_head = jnp.concatenate([h_new, h_new * h_new], axis=1)  # (B, 256), 128-aligned
    hd = jnp.dot(lhs_head, rhs_head_ref[...],
                 preferred_element_type=jnp.float32)            # (B, 256)
    out = hd[:, :LANE] + bo_ref[...] + jnp.sqrt(hd[:, LANE:]) * zm_ref[...]

    out_ref[...] = out          # lane-dense (B, 128) unmasked stores
    hnew_ref[...] = h_new


# --------------------------------------------------------------------------- #
# Wrapper: parameter preparation (do once per parameter update)
# --------------------------------------------------------------------------- #
def prepare_params(params):
    """exp() the log-variances and assemble block-diagonal, 128-lane-aligned RHS."""
    S = params["wi_mu"].shape[0]
    H = params["wh_mu"].shape[0]
    A = params["wo_mu"].shape[1]
    K = 2 * S + 2 * H

    wi_mu, wh_mu, wo_mu = params["wi_mu"], params["wh_mu"], params["wo_mu"]
    wi_var = jnp.exp(params["wi_lv"])          # hoisted out of the kernel
    wh_var = jnp.exp(params["wh_lv"])
    wo_var = jnp.exp(params["wo_lv"])

    # GRU RHS: rows [x | x*x | h | h*h], columns = 12 lane slots of 128.
    rhs_gru = jnp.zeros((K, 12 * LANE), jnp.float32)
    for gk in range(3):
        c = slice(gk * H, (gk + 1) * H)
        rhs_gru = rhs_gru.at[0:S,           (0 + gk) * LANE:(0 + gk) * LANE + H].set(wi_mu[:, c])
        rhs_gru = rhs_gru.at[S:2 * S,       (3 + gk) * LANE:(3 + gk) * LANE + H].set(wi_var[:, c])
        rhs_gru = rhs_gru.at[2 * S:2 * S + H, (6 + gk) * LANE:(6 + gk) * LANE + H].set(wh_mu[:, c])
        rhs_gru = rhs_gru.at[2 * S + H:K,   (9 + gk) * LANE:(9 + gk) * LANE + H].set(wh_var[:, c])

    # Head RHS: rows [h_new | h_new^2], columns = [o_mean slot | o_var slot].
    rhs_head = jnp.zeros((2 * LANE, 2 * LANE), jnp.float32)
    rhs_head = rhs_head.at[0:H, 0:A].set(wo_mu)
    rhs_head = rhs_head.at[LANE:LANE + H, LANE:LANE + A].set(wo_var)

    def pad_gate_bias(b):  # (1, 3H) -> (1, 3*128), each gate in its own lane slot
        bp = jnp.zeros((1, 3 * LANE), jnp.float32)
        for gk in range(3):
            bp = bp.at[:, gk * LANE:gk * LANE + H].set(b[:, gk * H:(gk + 1) * H])
        return bp

    return {
        "rhs_gru": rhs_gru,
        "rhs_head": rhs_head,
        "bi_pad": pad_gate_bias(params["bi"]),
        "bh_pad": pad_gate_bias(params["bh"]),
        "bo_pad": jnp.zeros((1, LANE), jnp.float32).at[:, :A].set(params["bo"]),
    }


# --------------------------------------------------------------------------- #
# Wrapper: forward pass
# --------------------------------------------------------------------------- #
def rl3c_forward(x, hx, zeta_gru, zeta_mu, prep):
    B, S = x.shape
    H = hx.shape[-1]
    A = zeta_mu.shape[-1]

    # Fused LHS for the GRU matmul and 128-lane-padded activations / noise.
    lhs_gru = jnp.concatenate([x, x * x, hx, hx * hx], axis=1)            # (B, 2S+2H)
    h_pad = jnp.zeros((B, LANE), jnp.float32).at[:, :H].set(hx)
    zg_pad = jnp.zeros((B, 3 * LANE), jnp.float32)
    for gk in range(3):
        zg_pad = zg_pad.at[:, gk * LANE:gk * LANE + H].set(
            zeta_gru[:, gk * H:(gk + 1) * H])
    zm_pad = jnp.zeros((B, LANE), jnp.float32).at[:, :A].set(zeta_mu)

    vmem = pl.BlockSpec(memory_space=pltpu.MemorySpace.VMEM)
    ins = [lhs_gru, h_pad, zg_pad, zm_pad,
           prep["rhs_gru"], prep["bi_pad"], prep["bh_pad"],
           prep["rhs_head"], prep["bo_pad"]]

    out_pad, hnew_pad = pl.pallas_call(
        rl3c_kernel,
        in_specs=[vmem] * len(ins),
        out_specs=(vmem, vmem),
        out_shape=(jax.ShapeDtypeStruct((B, LANE), jnp.float32),
                   jax.ShapeDtypeStruct((B, LANE), jnp.float32)),
    )(*ins)

    return out_pad[:, :A], hnew_pad[:, :H]


# --------------------------------------------------------------------------- #
# Pure-JAX reference
# --------------------------------------------------------------------------- #
def rl3c_reference(x, hx, zg, zm, p):
    H = hx.shape[-1]
    gi_m = x @ p["wi_mu"] + p["bi"]
    gi_v = (x * x) @ jnp.exp(p["wi_lv"])
    gh_m = hx @ p["wh_mu"] + p["bh"]
    gh_v = (hx * hx) @ jnp.exp(p["wh_lv"])
    sl = lambda a, k: a[:, k * H:(k + 1) * H]
    r = jax.nn.sigmoid(sl(gi_m, 0) + sl(gh_m, 0) + jnp.sqrt(sl(gi_v, 0) + sl(gh_v, 0)) * sl(zg, 0))
    z = jax.nn.sigmoid(sl(gi_m, 1) + sl(gh_m, 1) + jnp.sqrt(sl(gi_v, 1) + sl(gh_v, 1)) * sl(zg, 1))
    n = jnp.tanh(sl(gi_m, 2) + r * sl(gh_m, 2) + jnp.sqrt(sl(gi_v, 2) + r * r * sl(gh_v, 2)) * sl(zg, 2))
    h_new = (1.0 - z) * n + z * hx
    o = h_new @ p["wo_mu"] + p["bo"] + jnp.sqrt((h_new * h_new) @ jnp.exp(p["wo_lv"])) * zm
    return o, h_new


if __name__ == "__main__":
    # Small shapes consistent with RL3C(num_states, num_actions, num_hidden, 'gaussian')
    B, S, H, A = 8, 16, 32, 8

    key = jax.random.PRNGKey(0)
    ks = jax.random.split(key, 8)

    params = {
        "wi_mu": 0.1 * jax.random.normal(ks[0], (S, 3 * H), jnp.float32),
        "wi_lv": jnp.full((S, 3 * H), -10.0, jnp.float32),
        "wh_mu": 0.1 * jax.random.normal(ks[1], (H, 3 * H), jnp.float32),
        "wh_lv": jnp.full((H, 3 * H), -10.0, jnp.float32),
        "bi": jnp.zeros((1, 3 * H), jnp.float32),
        "bh": jnp.zeros((1, 3 * H), jnp.float32),
        "wo_mu": 0.1 * jax.random.normal(ks[2], (H, A), jnp.float32),
        "wo_lv": jnp.full((H, A), -10.0, jnp.float32),
        "bo": jnp.zeros((1, A), jnp.float32),
    }

    x = jax.random.normal(ks[3], (B, S), jnp.float32)
    hx = jnp.zeros((B, H), jnp.float32)                   # initial_states() == zeros
    zeta_gru = jax.random.normal(ks[4], (B, 3 * H), jnp.float32)
    zeta_mu = jax.random.normal(ks[5], (B, A), jnp.float32)

    prep = prepare_params(params)                         # exp()/block-diag done ONCE
    out, h_new = rl3c_forward(x, hx, zeta_gru, zeta_mu, prep)
    out, h_new = jax.block_until_ready((out, h_new))

    out_ref, h_ref = rl3c_reference(x, hx, zeta_gru, zeta_mu, params)
    assert jnp.allclose(out, out_ref, atol=1e-5, rtol=1e-5)
    assert jnp.allclose(h_new, h_ref, atol=1e-5, rtol=1e-5)

    print("KERNEL_OK")
</pallas_src>

<mosaic_0001>
module attributes {stable_mosaic.version = 11 : i64} {
  func.func @rl3c_kernel(%arg0: memref<8x96xf32, #tpu.memory_space<vmem>>, %arg1: memref<8x128xf32, #tpu.memory_space<vmem>>, %arg2: memref<8x384xf32, #tpu.memory_space<vmem>>, %arg3: memref<8x128xf32, #tpu.memory_space<vmem>>, %arg4: memref<96x1536xf32, #tpu.memory_space<vmem>>, %arg5: memref<1x384xf32, #tpu.memory_space<vmem>>, %arg6: memref<1x384xf32, #tpu.memory_space<vmem>>, %arg7: memref<256x256xf32, #tpu.memory_space<vmem>>, %arg8: memref<1x128xf32, #tpu.memory_space<vmem>>, %arg9: memref<8x128xf32, #tpu.memory_space<vmem>>, %arg10: memref<8x128xf32, #tpu.memory_space<vmem>>) attributes {dimension_semantics = [], scalar_prefetch = 0 : i64, scratch_operands = 0 : i64, tpu.core_type = #tpu.core_type<tc>} {
    %c0 = arith.constant 0 : index
    %c0_0 = arith.constant 0 : index
    %0 = vector.load %arg0[%c0, %c0_0] : memref<8x96xf32, #tpu.memory_space<vmem>>, vector<8x96xf32>
    %c0_1 = arith.constant 0 : index
    %c0_2 = arith.constant 0 : index
    %1 = vector.load %arg4[%c0_1, %c0_2] : memref<96x1536xf32, #tpu.memory_space<vmem>>, vector<96x1536xf32>
    %cst = arith.constant dense<0.000000e+00> : vector<8x1536xf32>
    %2 = tpu.matmul %0, %1, %cst {dimension_numbers = #tpu.dot_dimension_numbers<[1], [0], [0], [1], [0, 0, 1, 1], [], []>} : vector<8x96xf32>, vector<96x1536xf32>, vector<8x1536xf32> -> vector<8x1536xf32>
    %3 = vector.extract_strided_slice %2 {offsets = [0, 0], sizes = [8, 384], strides = [1, 1]} : vector<8x1536xf32> to vector<8x384xf32>
    %c0_3 = arith.constant 0 : index
    %c0_4 = arith.constant 0 : index
    %4 = vector.load %arg5[%c0_3, %c0_4] : memref<1x384xf32, #tpu.memory_space<vmem>>, vector<1x384xf32>
    %5 = vector.broadcast %4 : vector<1x384xf32> to vector<8x384xf32>
    %6 = arith.addf %3, %5 : vector<8x384xf32>
    %7 = vector.extract_strided_slice %2 {offsets = [0, 384], sizes = [8, 384], strides = [1, 1]} : vector<8x1536xf32> to vector<8x384xf32>
    %8 = vector.extract_strided_slice %2 {offsets = [0, 768], sizes = [8, 384], strides = [1, 1]} : vector<8x1536xf32> to vector<8x384xf32>
    %c0_5 = arith.constant 0 : index
    %c0_6 = arith.constant 0 : index
    %9 = vector.load %arg6[%c0_5, %c0_6] : memref<1x384xf32, #tpu.memory_space<vmem>>, vector<1x384xf32>
    %10 = vector.broadcast %9 : vector<1x384xf32> to vector<8x384xf32>
    %11 = arith.addf %8, %10 : vector<8x384xf32>
    %12 = vector.extract_strided_slice %2 {offsets = [0, 1152], sizes = [8, 384], strides = [1, 1]} : vector<8x1536xf32> to vector<8x384xf32>
    %c0_7 = arith.constant 0 : index
    %c0_8 = arith.constant 0 : index
    %13 = vector.load %arg2[%c0_7, %c0_8] : memref<8x384xf32, #tpu.memory_space<vmem>>, vector<8x384xf32>
    %14 = vector.extract_strided_slice %13 {offsets = [0, 0], sizes = [8, 128], strides = [1, 1]} : vector<8x384xf32> to vector<8x128xf32>
    %15 = vector.extract_strided_slice %13 {offsets = [0, 128], sizes = [8, 128], strides = [1, 1]} : vector<8x384xf32> to vector<8x128xf32>
    %16 = vector.extract_strided_slice %13 {offsets = [0, 256], sizes = [8, 128], strides = [1, 1]} : vector<8x384xf32> to vector<8x128xf32>
    %17 = vector.extract_strided_slice %6 {offsets = [0, 0], sizes = [8, 128], strides = [1, 1]} : vector<8x384xf32> to vector<8x128xf32>
    %18 = vector.extract_strided_slice %11 {offsets = [0, 0], sizes = [8, 128], strides = [1, 1]} : vector<8x384xf32> to vector<8x128xf32>
    %19 = arith.addf %17, %18 : vector<8x128xf32>
    %20 = vector.extract_strided_slice %7 {offsets = [0, 0], sizes = [8, 128], strides = [1, 1]} : vector<8x384xf32> to vector<8x128xf32>
    %21 = vector.extract_strided_slice %12 {offsets = [0, 0], sizes = [8, 128], strides = [1, 1]} : vector<8x384xf32> to vector<8x128xf32>
    %22 = arith.addf %20, %21 : vector<8x128xf32>
    %23 = math.sqrt %22 : vector<8x128xf32>
    %24 = arith.mulf %23, %14 : vector<8x128xf32>
    %25 = arith.addf %19, %24 : vector<8x128xf32>
    %26 = arith.negf %25 : vector<8x128xf32>
    %27 = math.exp %26 : vector<8x128xf32>
    %cst_9 = arith.constant 1.000000e+00 : f32
    %28 = vector.broadcast %cst_9 : f32 to vector<8x128xf32>
    %29 = arith.addf %28, %27 : vector<8x128xf32>
    %30 = arith.divf %28, %29 : vector<8x128xf32>
    %31 = vector.extract_strided_slice %6 {offsets = [0, 128], sizes = [8, 128], strides = [1, 1]} : vector<8x384xf32> to vector<8x128xf32>
    %32 = vector.extract_strided_slice %11 {offsets = [0, 128], sizes = [8, 128], strides = [1, 1]} : vector<8x384xf32> to vector<8x128xf32>
    %33 = arith.addf %31, %32 : vector<8x128xf32>
    %34 = vector.extract_strided_slice %7 {offsets = [0, 128], sizes = [8, 128], strides = [1, 1]} : vector<8x384xf32> to vector<8x128xf32>
    %35 = vector.extract_strided_slice %12 {offsets = [0, 128], sizes = [8, 128], strides = [1, 1]} : vector<8x384xf32> to vector<8x128xf32>
    %36 = arith.addf %34, %35 : vector<8x128xf32>
    %37 = math.sqrt %36 : vector<8x128xf32>
    %38 = arith.mulf %37, %15 : vector<8x128xf32>
    %39 = arith.addf %33, %38 : vector<8x128xf32>
    %40 = arith.negf %39 : vector<8x128xf32>
    %41 = math.exp %40 : vector<8x128xf32>
    %cst_10 = arith.constant 1.000000e+00 : f32
    %42 = vector.broadcast %cst_10 : f32 to vector<8x128xf32>
    %43 = arith.addf %42, %41 : vector<8x128xf32>
    %44 = arith.divf %42, %43 : vector<8x128xf32>
    %45 = vector.extract_strided_slice %6 {offsets = [0, 256], sizes = [8, 128], strides = [1, 1]} : vector<8x384xf32> to vector<8x128xf32>
    %46 = vector.extract_strided_slice %11 {offsets = [0, 256], sizes = [8, 128], strides = [1, 1]} : vector<8x384xf32> to vector<8x128xf32>
    %47 = arith.mulf %30, %46 : vector<8x128xf32>
    %48 = arith.addf %45, %47 : vector<8x128xf32>
    %49 = vector.extract_strided_slice %7 {offsets = [0, 256], sizes = [8, 128], strides = [1, 1]} : vector<8x384xf32> to vector<8x128xf32>
    %50 = arith.mulf %30, %30 : vector<8x128xf32>
    %51 = vector.extract_strided_slice %12 {offsets = [0, 256], sizes = [8, 128], strides = [1, 1]} : vector<8x384xf32> to vector<8x128xf32>
    %52 = arith.mulf %50, %51 : vector<8x128xf32>
    %53 = arith.addf %49, %52 : vector<8x128xf32>
    %54 = math.sqrt %53 : vector<8x128xf32>
    %55 = arith.mulf %54, %16 : vector<8x128xf32>
    %56 = arith.addf %48, %55 : vector<8x128xf32>
    %57 = math.tanh %56 : vector<8x128xf32>
    %cst_11 = arith.constant 1.000000e+00 : f32
    %58 = vector.broadcast %cst_11 : f32 to vector<8x128xf32>
    %59 = arith.subf %58, %44 : vector<8x128xf32>
    %60 = arith.mulf %59, %57 : vector<8x128xf32>
    %c0_12 = arith.constant 0 : index
    %c0_13 = arith.constant 0 : index
    %61 = vector.load %arg1[%c0_12, %c0_13] : memref<8x128xf32, #tpu.memory_space<vmem>>, vector<8x128xf32>
    %62 = arith.mulf %44, %61 : vector<8x128xf32>
    %63 = arith.addf %60, %62 : vector<8x128xf32>
    %64 = arith.mulf %63, %63 : vector<8x128xf32>
    %65 = tpu.concatenate %63, %64 in 1 : vector<8x128xf32>, vector<8x128xf32> -> vector<8x256xf32>
    %c0_14 = arith.constant 0 : index
    %c0_15 = arith.constant 0 : index
    %66 = vector.load %arg7[%c0_14, %c0_15] : memref<256x256xf32, #tpu.memory_space<vmem>>, vector<256x256xf32>
    %cst_16 = arith.constant dense<0.000000e+00> : vector<8x256xf32>
    %67 = tpu.matmul %65, %66, %cst_16 {dimension_numbers = #tpu.dot_dimension_numbers<[1], [0], [0], [1], [0, 0, 1, 1], [], []>} : vector<8x256xf32>, vector<256x256xf32>, vector<8x256xf32> -> vector<8x256xf32>
    %68 = vector.extract_strided_slice %67 {offsets = [0, 0], sizes = [8, 128], strides = [1, 1]} : vector<8x256xf32> to vector<8x128xf32>
    %c0_17 = arith.constant 0 : index
    %c0_18 = arith.constant 0 : index
    %69 = vector.load %arg8[%c0_17, %c0_18] : memref<1x128xf32, #tpu.memory_space<vmem>>, vector<1x128xf32>
    %70 = vector.broadcast %69 : vector<1x128xf32> to vector<8x128xf32>
    %71 = arith.addf %68, %70 : vector<8x128xf32>
    %72 = vector.extract_strided_slice %67 {offsets = [0, 128], sizes = [8, 128], strides = [1, 1]} : vector<8x256xf32> to vector<8x128xf32>
    %73 = math.sqrt %72 : vector<8x128xf32>
    %c0_19 = arith.constant 0 : index
    %c0_20 = arith.constant 0 : index
    %74 = vector.load %arg3[%c0_19, %c0_20] : memref<8x128xf32, #tpu.memory_space<vmem>>, vector<8x128xf32>
    %75 = arith.mulf %73, %74 : vector<8x128xf32>
    %76 = arith.addf %71, %75 : vector<8x128xf32>
    %c0_21 = arith.constant 0 : index
    %c0_22 = arith.constant 0 : index
    %77 = vector.load %arg9[%c0_21, %c0_22] : memref<8x128xf32, #tpu.memory_space<vmem>>, vector<8x128xf32>
    tpu.vector_store %arg9[%c0_21, %c0_22], %76 {strides = array<i32>} : memref<8x128xf32, #tpu.memory_space<vmem>>, vector<8x128xf32>,
    %c0_23 = arith.constant 0 : index
    %c0_24 = arith.constant 0 : index
    %78 = vector.load %arg10[%c0_23, %c0_24] : memref<8x128xf32, #tpu.memory_space<vmem>>, vector<8x128xf32>
    tpu.vector_store %arg10[%c0_23, %c0_24], %63 {strides = array<i32>} : memref<8x128xf32, #tpu.memory_space<vmem>>, vector<8x128xf32>,
    return
  }
}

</mosaic_0001>

<bundles_post_ra>
// kernel: tpu_custom_call.1
= control target key start
LH: loop header
LB: loop body
LE: loop exit
PB: predicated region body
PF: predicated region fallthrough
CT: control target
= control target key end

     0   :  { %16 = vsyncpa [#allocation3], 0  ;;  %s1284_s0 = inlined_call_operand.hbm [shape: f32[8,96], index: 0, kind: input, shape index: {}]   ;;  %s1285_s1 = inlined_call_operand.hbm [shape: f32[8,128], index: 1, kind: input, shape index: {}]   ;;  %s1286_s2 = inlined_call_operand.hbm [shape: f32[8,384], index: 2, kind: input, shape index: {}]   ;;  %s1287_s3 = inlined_call_operand.hbm [shape: f32[8,128], index: 3, kind: input, shape index: {}]   ;;  %s1288_s4 = inlined_call_operand.hbm [shape: f32[96,1536], index: 4, kind: input, shape index: {}]   ;;  %s1289_s5 = inlined_call_operand.vmem [shape: f32[1,384], index: 5, kind: input, shape index: {}]   ;;  %s1290_s6 = inlined_call_operand.hbm [shape: f32[1,384], index: 6, kind: input, shape index: {}]   ;;  %s1291_s7 = inlined_call_operand.hbm [shape: f32[256,256], index: 7, kind: input, shape index: {}]   ;;  %s1292_s8 = inlined_call_operand.vmem [shape: f32[1,128], index: 8, kind: input, shape index: {}]   ;;  %s1293_s9 = inlined_call_operand.hbm [shape: f32[8,128], index: 9, kind: output, shape index: {0}]   ;;  %s1294_s10 = inlined_call_operand.hbm [shape: f32[8,128], index: 10, kind: output, shape index: {1}]  }
   0x1   :  { %17 = vsyncpa [#allocation6], 0 }
   0x2   :  { %18 = vsyncpa [#allocation9], 0 }
   0x3   :  { %19 = vsyncpa [#allocation12], 0 }
   0x4   :  { %20 = vsyncpa [#allocation4], 0  ;;  %s38_s15 = sshll.u32 %s1285_s1, 4  ;;  %s39_s15 = int_to_ptr.hbm [resolvable:$true] %s38_s15 }
   0x5   :  { %21 = vsyncpa [#allocation16], 0  ;;  %s1121_s16 = smov [#allocation5]   ;;  %s60_s20 = sshll.u32 %s1287_s3, 4  ;;  %s61_s20 = int_to_ptr.hbm [resolvable:$true] %s60_s20 }
   0x6   :  { %s40_s17 = sshll.u32 %s1121_s16, 4  ;;  %s1122_s21 = smov [#allocation8]   ;;  %s41_s17 = int_to_ptr.vmem [resolvable:$true] %s40_s17 }
   0x7   :  { %43 = dma.hbm_to_vmem [thread:$0]  %s39_s15, 128, %s41_s17, [#allocation6]  }
   0x8   :  { %s62_s22 = sshll.u32 %s1122_s21, 4  ;;  %s86_s25 = sshll.u32 %s1290_s6, 4  ;;  %s63_s22 = int_to_ptr.vmem [resolvable:$true] %s62_s22  ;;  %s87_s25 = int_to_ptr.hbm [resolvable:$true] %s86_s25 }
   0x9   :  { %65 = dma.hbm_to_vmem [thread:$0]  %s61_s20, 128, %s63_s22, [#allocation9]  }
   0xa   :  { %s27_s27 = sshll.u32 %s1284_s0, 4  ;;  %s1123_s28 = smov [#allocation11]   ;;  %s28_s27 = int_to_ptr.hbm [resolvable:$true] %s27_s27 }
   0xb   :  { %s88_s29 = sshll.u32 %s1123_s28, 4  ;;  %s1124_s3 = smov [#allocation2]   ;;  %s89_s29 = int_to_ptr.vmem [resolvable:$true] %s88_s29 }
   0xc   :  { %91 = dma.hbm_to_vmem [thread:$0]  %s87_s25, 48, %s89_s29, [#allocation12]  }
   0xd   :  { %s29_s30 = sshll.u32 %s1124_s3, 4  ;;  %s49_s13 = sshll.u32 %s1286_s2, 4  ;;  %s30_s30 = int_to_ptr.vmem [resolvable:$true] %s29_s30  ;;  %s50_s13 = int_to_ptr.hbm [resolvable:$true] %s49_s13 }
   0xe   :  { %32 = dma.hbm_to_vmem [thread:$0]  %s28_s27, 128, %s30_s30, [#allocation3]  }
   0xf   :  { %s70_s15 = sshll.u32 %s1288_s4, 4  ;;  %s1125_s16 = smov [#allocation7]   ;;  %s71_s15 = int_to_ptr.hbm [resolvable:$true] %s70_s15 }
  0x10   :  { %s51_s0 = sshll.u32 %s1125_s16, 4  ;;  %s1126_s17 = smov [#allocation10]   ;;  %s52_s0 = int_to_ptr.vmem [resolvable:$true] %s51_s0 }
  0x11   :  { %54 = dma.hbm_to_vmem [thread:$0]  %s50_s13, 384, %s52_s0, [#allocation6]  }
  0x12   :  { %s72_s18 = sshll.u32 %s1126_s17, 4  ;;  %s1127_s19 = smov 1536   ;;  %s73_s18 = int_to_ptr.vmem [resolvable:$true] %s72_s18 }
  0x13   :  { %s1128_s20 = smov 96   ;;  %s96_s22 = sshll.u32 %s1291_s7, 4  ;;  %s97_s22 = int_to_ptr.hbm [resolvable:$true] %s96_s22 }
  0x14   :  { %78 = dma.hbm_to_vmem [thread:$0]  %s71_s15, 18432, %s73_s18, [#allocation9], %s1127_s19, %s1127_s19, %s1128_s20  }
  0x15   :  { %s1129_s23 = smov [#allocation13]   ;;  %s1130_s4 = smov 256  }
  0x16   :  { %s98_s24 = sshll.u32 %s1129_s23, 4  ;;  %s1131_s25 = smov 16   ;;  %s99_s24 = int_to_ptr.vmem [resolvable:$true] %s98_s24 }
  0x17   :  { %104 = dma.hbm_to_vmem [thread:$0]  %s97_s22, 8192, %s99_s24, [#allocation12], %s1130_s4, %s1130_s4, %s1131_s25  }
  0x18   :  { %1109 = dma.done.wait [#allocation3], 128  }
  0x19   :  { %1110 = vsyncadd [#allocation3], 4294967168 }
  0x1a   :  { %1111 = dma.done.wait [#allocation6], 512  }
  0x1b   :  { %1112 = vsyncadd [#allocation6], 4294966784 }
  0x1c   :  { %1113 = dma.done.wait [#allocation9], 18560  }
  0x1d   :  { %1114 = vsyncadd [#allocation9], 4294948736 }
  0x1e   :  { %1115 = dma.done.wait [#allocation12], 8240  }
  0x1f   :  { %1116 = vsyncadd [#allocation12], 4294959056  ;;  %v269_v0 = vld [vmem:[#allocation10 + $0x428] sm:$0xff]  ;;  %v270_v1 = vld [vmem:[#allocation10 + $0x430] sm:$0xff]  ;;  %vm280_vm0 = vcmask 785408   ;;  %s829_s29 = sshll.u32 %s1294_s10, 4  ;;  %s830_s29 = int_to_ptr.hbm [resolvable:$true] %s829_s29 }
  0x20   :  { %v271_v2 = vld [vmem:[#allocation10 + $0x438] sm:$0xff]  ;;  %308 = vmatpush.msra.mxu1 %v269_v0  ;;  %328 = vmatpush.msra.mxu2 %v270_v1  ;;  %v257_v3 = vld [vmem:[#allocation10 + $0x3c8] sm:$0xff]  ;;  %v258_v4 = vld [vmem:[#allocation10 + $0x3d0] sm:$0xff]  ;;  %s1133_s10 = smov [#allocation14]   ;;  %s818_s6 = sshll.u32 %s1293_s9, 4  ;;  %s819_s6 = int_to_ptr.hbm [resolvable:$true] %s818_s6 }
  0x21   :  { %v259_v5 = vld [vmem:[#allocation10 + $0x3d8] sm:$0xff]  ;;  %348 = vmatpush.msra.mxu3 %v271_v2  ;;  %v245_v6 = vld [vmem:[#allocation10 + $0x368] sm:$0xff]  ;;  %v246_v7 = vld [vmem:[#allocation10 + $0x370] sm:$0xff]  ;;  %s816_s11 = sshll.u32 %s1133_s10, 4  ;;  %s817_s11 = int_to_ptr.vmem [resolvable:$true] %s816_s11 }
  0x22   :  { %309 = vmatpush.msra.mxu1 %v257_v3  ;;  %329 = vmatpush.msra.mxu2 %v258_v4  ;;  %v247_v8 = vld [vmem:[#allocation10 + $0x378] sm:$0xff]  ;;  %v233_v9 = vld [vmem:[#allocation10 + $0x308] sm:$0xff]  ;;  %v234_v10 = vld [vmem:[#allocation10 + $0x310] sm:$0xff] }
  0x23   :  { %349 = vmatpush.msra.mxu3 %v259_v5  ;;  %v235_v11 = vld [vmem:[#allocation10 + $0x318] sm:$0xff]  ;;  %v221_v12 = vld [vmem:[#allocation10 + $0x2a8] sm:$0xff]  ;;  %v222_v13 = vld [vmem:[#allocation10 + $0x2b0] sm:$0xff] }
  0x24   :  { %310 = vmatpush.msra.mxu1 %v245_v6  ;;  %330 = vmatpush.msra.mxu2 %v246_v7  ;;  %v223_v14 = vld [vmem:[#allocation10 + $0x2b8] sm:$0xff]  ;;  %v209_v15 = vld [vmem:[#allocation10 + $0x248] sm:$0xff]  ;;  %v210_v16 = vld [vmem:[#allocation10 + $0x250] sm:$0xff] }
  0x25   :  { %350 = vmatpush.msra.mxu3 %v247_v8  ;;  %v211_v17 = vld [vmem:[#allocation10 + $0x258] sm:$0xff]  ;;  %v197_v18 = vld [vmem:[#allocation10 + $0x1e8] sm:$0xff]  ;;  %v198_v19 = vld [vmem:[#allocation10 + $0x1f0] sm:$0xff] }
  0x26   :  { %311 = vmatpush.msra.mxu1 %v233_v9  ;;  %331 = vmatpush.msra.mxu2 %v234_v10  ;;  %v199_v20 = vld [vmem:[#allocation10 + $0x1f8] sm:$0xff]  ;;  %v185_v21 = vld [vmem:[#allocation10 + $0x188] sm:$0xff]  ;;  %v186_v22 = vld [vmem:[#allocation10 + $0x190] sm:$0xff] }
  0x27   :  { %351 = vmatpush.msra.mxu3 %v235_v11  ;;  %v187_v23 = vld [vmem:[#allocation10 + $0x198] sm:$0xff]  ;;  %v173_v24 = vld [vmem:[#allocation10 + $0x128] sm:$0xff]  ;;  %v174_v25 = vld [vmem:[#allocation10 + $0x130] sm:$0xff] }
  0x28   :  { %312 = vmatpush.msra.mxu1 %v221_v12  ;;  %332 = vmatpush.msra.mxu2 %v222_v13  ;;  %v175_v26 = vld [vmem:[#allocation10 + $0x138] sm:$0xff]  ;;  %v268_v27 = vld [vmem:[#allocation10 + $0x420] sm:$0xff]  ;;  %v161_v28 = vld [vmem:[#allocation10 + $0xc8] sm:$0xff] }
  0x29   :  { %352 = vmatpush.msra.mxu3 %v223_v14  ;;  %v162_v29 = vld [vmem:[#allocation10 + $0xd0] sm:$0xff]  ;;  %288 = vmatpush.msra.mxu0 %v268_v27  ;;  %v256_v30 = vld [vmem:[#allocation10 + $0x3c0] sm:$0xff]  ;;  %v163_v31 = vld [vmem:[#allocation10 + $0xd8] sm:$0xff] }
  0x2a   :  { %313 = vmatpush.msra.mxu1 %v209_v15  ;;  %333 = vmatpush.msra.mxu2 %v210_v16  ;;  %v244_v32 = vld [vmem:[#allocation10 + $0x360] sm:$0xff]  ;;  %v149_v33 = vld [vmem:[#allocation10 + $0x68] sm:$0xff]  ;;  %v150_v34 = vld [vmem:[#allocation10 + $0x70] sm:$0xff] }
  0x2b   :  { %353 = vmatpush.msra.mxu3 %v211_v17  ;;  %289 = vmatpush.msra.mxu0 %v256_v30  ;;  %v151_v35 = vld [vmem:[#allocation10 + $0x78] sm:$0xff]  ;;  %v232_v36 = vld [vmem:[#allocation10 + $0x300] sm:$0xff]  ;;  %v137_v37 = vld [vmem:[#allocation10 + $0x8] sm:$0xff] }
  0x2c   :  { %314 = vmatpush.msra.mxu1 %v197_v18  ;;  %334 = vmatpush.msra.mxu2 %v198_v19  ;;  %v138_v38 = vld [vmem:[#allocation10 + $0x10] sm:$0xff]  ;;  %v139_v39 = vld [vmem:[#allocation10 + $0x18] sm:$0xff]  ;;  %v273_v40 = vld [vmem:[#allocation10 + $0x448] sm:$0xff] }
  0x2d   :  { %354 = vmatpush.msra.mxu3 %v199_v20  ;;  %290 = vmatpush.msra.mxu0 %v244_v32  ;;  %v274_v41 = vld [vmem:[#allocation10 + $0x450] sm:$0xff]  ;;  %v275_v42 = vld [vmem:[#allocation10 + $0x458] sm:$0xff]  ;;  %v261_v43 = vld [vmem:[#allocation10 + $0x3e8] sm:$0xff] }
  0x2e   :  { %315 = vmatpush.msra.mxu1 %v185_v21  ;;  %335 = vmatpush.msra.mxu2 %v186_v22  ;;  %v220_v44 = vld [vmem:[#allocation10 + $0x2a0] sm:$0xff]  ;;  %v262_v45 = vld [vmem:[#allocation10 + $0x3f0] sm:$0xff]  ;;  %v263_v46 = vld [vmem:[#allocation10 + $0x3f8] sm:$0xff] }
  0x2f   :  { %355 = vmatpush.msra.mxu3 %v187_v23  ;;  %291 = vmatpush.msra.mxu0 %v232_v36  ;;  %v249_v47 = vld [vmem:[#allocation10 + $0x388] sm:$0xff]  ;;  %v1210_v48 = vld [vmem:[#allocation2] sm:$0xff]  ;;  %v251_v50 = vld [vmem:[#allocation10 + $0x398] sm:$0xff] }
  0x30   :  { %316 = vmatpush.msra.mxu1 %v173_v24  ;;  %336 = vmatpush.msra.mxu2 %v174_v25  ;;  %v250_v49 = vld [vmem:[#allocation10 + $0x390] sm:$0xff]  ;;  %v237_v51 = vld [vmem:[#allocation10 + $0x328] sm:$0xff]  ;;  %v208_v52 = vld [vmem:[#allocation10 + $0x240] sm:$0xff] }
  0x31   :  { %356 = vmatpush.msra.mxu3 %v175_v26  ;;  %292 = vmatpush.msra.mxu0 %v220_v44  ;;  %v238_v53 = vld [vmem:[#allocation10 + $0x330] sm:$0xff]  ;;  %v239_v54 = vld [vmem:[#allocation10 + $0x338] sm:$0xff]  ;;  %v225_v55 = vld [vmem:[#allocation10 + $0x2c8] sm:$0xff] }
  0x32   :  { %317 = vmatpush.msra.mxu1 %v161_v28  ;;  %337 = vmatpush.msra.mxu2 %v162_v29  ;;  %v196_v56 = vld [vmem:[#allocation10 + $0x1e0] sm:$0xff]  ;;  %v226_v57 = vld [vmem:[#allocation10 + $0x2d0] sm:$0xff]  ;;  %v227_v58 = vld [vmem:[#allocation10 + $0x2d8] sm:$0xff] }
  0x33   :  { %357 = vmatpush.msra.mxu3 %v163_v31  ;;  %293 = vmatpush.msra.mxu0 %v208_v52  ;;  %v213_v59 = vld [vmem:[#allocation10 + $0x268] sm:$0xff]  ;;  %v184_v60 = vld [vmem:[#allocation10 + $0x180] sm:$0xff]  ;;  %v214_v61 = vld [vmem:[#allocation10 + $0x270] sm:$0xff] }
  0x34   :  { %318 = vmatpush.msra.mxu1 %v149_v33  ;;  %338 = vmatpush.msra.mxu2 %v150_v34  ;;  %v215_v62 = vld [vmem:[#allocation10 + $0x278] sm:$0xff]  ;;  %v201_v63 = vld [vmem:[#allocation10 + $0x208] sm:$0xff]  ;;  %v172_v0 = vld [vmem:[#allocation10 + $0x120] sm:$0xff] }
  0x35   :  { %358 = vmatpush.msra.mxu3 %v151_v35  ;;  %294 = vmatpush.msra.mxu0 %v196_v56  ;;  %v202_v1 = vld [vmem:[#allocation10 + $0x210] sm:$0xff]  ;;  %v203_v2 = vld [vmem:[#allocation10 + $0x218] sm:$0xff]  ;;  %v189_v3 = vld [vmem:[#allocation10 + $0x1a8] sm:$0xff] }
  0x36   :  { %319 = vmatpush.msra.mxu1 %v137_v37  ;;  %339 = vmatpush.msra.mxu2 %v138_v38  ;;  %v190_v4 = vld [vmem:[#allocation10 + $0x1b0] sm:$0xff]  ;;  %v191_v5 = vld [vmem:[#allocation10 + $0x1b8] sm:$0xff]  ;;  %v177_v6 = vld [vmem:[#allocation10 + $0x148] sm:$0xff] }
  0x37   :  { %359 = vmatpush.msra.mxu3 %v139_v39  ;;  %295 = vmatpush.msra.mxu0 %v184_v60  ;;  %v160_v7 = vld [vmem:[#allocation10 + $0xc0] sm:$0xff]  ;;  %v178_v8 = vld [vmem:[#allocation10 + $0x150] sm:$0xff]  ;;  %v179_v9 = vld [vmem:[#allocation10 + $0x158] sm:$0xff] }
  0x38   :  { %388 = vmatpush.msrb.mxu1 %v273_v40  ;;  %408 = vmatpush.msrb.mxu2 %v274_v41  ;;  %v165_v10 = vld [vmem:[#allocation10 + $0xe8] sm:$0xff]  ;;  %v148_v11 = vld [vmem:[#allocation10 + $0x60] sm:$0xff]  ;;  %v166_v12 = vld [vmem:[#allocation10 + $0xf0] sm:$0xff] }
  0x39   :  { %428 = vmatpush.msrb.mxu3 %v275_v42  ;;  %296 = vmatpush.msra.mxu0 %v172_v0  ;;  %v167_v13 = vld [vmem:[#allocation10 + $0xf8] sm:$0xff]  ;;  %v153_v14 = vld [vmem:[#allocation10 + $0x88] sm:$0xff]  ;;  %v136_v15 = vld [vmem:[#allocation10] sm:$0xff] }
  0x3a   :  { %389 = vmatpush.msrb.mxu1 %v261_v43  ;;  %409 = vmatpush.msrb.mxu2 %v262_v45  ;;  %v154_v16 = vld [vmem:[#allocation10 + $0x90] sm:$0xff]  ;;  %v155_v17 = vld [vmem:[#allocation10 + $0x98] sm:$0xff]  ;;  %v141_v18 = vld [vmem:[#allocation10 + $0x28] sm:$0xff] }
  0x3b   :  { %429 = vmatpush.msrb.mxu3 %v263_v46  ;;  %849 = vmatmul.msk.f32.vlgmr.msra.gmra.mxu2 %vm280_vm0, %v1210_v48  ;;  %v272_v19 = vld [vmem:[#allocation10 + $0x440] sm:$0xff]  ;;  %v142_v20 = vld [vmem:[#allocation10 + $0x30] sm:$0xff]  ;;  %v143_v21 = vld [vmem:[#allocation10 + $0x38] sm:$0xff] }
  0x3c   :  { %390 = vmatpush.msrb.mxu1 %v249_v47  ;;  %850 = vmatmul.msk.f32.vlgmr.msra.gmra.mxu3 %vm280_vm0, %v1210_v48  ;;  %v277_v22 = vld [vmem:[#allocation10 + $0x468] sm:$0xff]  ;;  %v278_v23 = vld [vmem:[#allocation10 + $0x470] sm:$0xff]  ;;  %v260_v24 = vld [vmem:[#allocation10 + $0x3e0] sm:$0xff] }
  0x3d   :  { %410 = vmatpush.msrb.mxu2 %v250_v49  ;;  %430 = vmatpush.msrb.mxu3 %v251_v50  ;;  %v265_v25 = vld [vmem:[#allocation10 + $0x408] sm:$0xff]  ;;  %v266_v26 = vld [vmem:[#allocation10 + $0x410] sm:$0xff]  ;;  %v248_v27 = vld [vmem:[#allocation10 + $0x380] sm:$0xff] }
  0x3e   :  { %391 = vmatpush.msrb.mxu1 %v237_v51  ;;  %297 = vmatpush.msra.mxu0 %v160_v7  ;;  %v279_v28 = vld [vmem:[#allocation10 + $0x478] sm:$0xff]  ;;  %v253_v29 = vld [vmem:[#allocation10 + $0x3a8] sm:$0xff]  ;;  %v254_v30 = vld [vmem:[#allocation10 + $0x3b0] sm:$0xff] }
  0x3f   :  { %411 = vmatpush.msrb.mxu2 %v238_v53  ;;  %431 = vmatpush.msrb.mxu3 %v239_v54  ;;  %v236_v31 = vld [vmem:[#allocation10 + $0x320] sm:$0xff]  ;;  %v267_v32 = vld [vmem:[#allocation10 + $0x418] sm:$0xff]  ;;  %v241_v33 = vld [vmem:[#allocation10 + $0x348] sm:$0xff] }
  0x40   :  { %392 = vmatpush.msrb.mxu1 %v225_v55  ;;  %298 = vmatpush.msra.mxu0 %v148_v11  ;;  %v242_v34 = vld [vmem:[#allocation10 + $0x350] sm:$0xff]  ;;  %v224_v35 = vld [vmem:[#allocation10 + $0x2c0] sm:$0xff]  ;;  %v229_v36 = vld [vmem:[#allocation10 + $0x2e8] sm:$0xff] }
  0x41   :  { %412 = vmatpush.msrb.mxu2 %v226_v57  ;;  %432 = vmatpush.msrb.mxu3 %v227_v58  ;;  %v230_v37 = vld [vmem:[#allocation10 + $0x2f0] sm:$0xff]  ;;  %v212_v38 = vld [vmem:[#allocation10 + $0x260] sm:$0xff]  ;;  %v255_v39 = vld [vmem:[#allocation10 + $0x3b8] sm:$0xff] }
  0x42   :  { %393 = vmatpush.msrb.mxu1 %v213_v59  ;;  %299 = vmatpush.msra.mxu0 %v136_v15  ;;  %v217_v40 = vld [vmem:[#allocation10 + $0x288] sm:$0xff]  ;;  %v218_v41 = vld [vmem:[#allocation10 + $0x290] sm:$0xff]  ;;  %v200_v42 = vld [vmem:[#allocation10 + $0x200] sm:$0xff] }
  0x43   :  { %413 = vmatpush.msrb.mxu2 %v214_v61  ;;  %433 = vmatpush.msrb.mxu3 %v215_v62  ;;  %v243_v43 = vld [vmem:[#allocation10 + $0x358] sm:$0xff]  ;;  %v205_v44 = vld [vmem:[#allocation10 + $0x228] sm:$0xff]  ;;  %v206_v45 = vld [vmem:[#allocation10 + $0x230] sm:$0xff] }
  0x44   :  { %394 = vmatpush.msrb.mxu1 %v201_v63  ;;  %368 = vmatpush.msrb.mxu0 %v272_v19  ;;  %v188_v46 = vld [vmem:[#allocation10 + $0x1a0] sm:$0xff]  ;;  %v231_v47 = vld [vmem:[#allocation10 + $0x2f8] sm:$0xff]  ;;  %v193_v49 = vld [vmem:[#allocation10 + $0x1c8] sm:$0xff] }
  0x45   :  { %414 = vmatpush.msrb.mxu2 %v202_v1  ;;  %434 = vmatpush.msrb.mxu3 %v203_v2  ;;  %v194_v50 = vld [vmem:[#allocation10 + $0x1d0] sm:$0xff]  ;;  %v219_v51 = vld [vmem:[#allocation10 + $0x298] sm:$0xff]  ;;  %v181_v52 = vld [vmem:[#allocation10 + $0x168] sm:$0xff] }
  0x46   :  { %395 = vmatpush.msrb.mxu1 %v189_v3  ;;  %369 = vmatpush.msrb.mxu0 %v260_v24  ;;  %v182_v53 = vld [vmem:[#allocation10 + $0x170] sm:$0xff]  ;;  %v176_v54 = vld [vmem:[#allocation10 + $0x140] sm:$0xff]  ;;  %v207_v55 = vld [vmem:[#allocation10 + $0x238] sm:$0xff] }
  0x47   :  { %415 = vmatpush.msrb.mxu2 %v190_v4  ;;  %435 = vmatpush.msrb.mxu3 %v191_v5  ;;  %v169_v56 = vld [vmem:[#allocation10 + $0x108] sm:$0xff]  ;;  %v170_v57 = vld [vmem:[#allocation10 + $0x110] sm:$0xff]  ;;  %v164_v58 = vld [vmem:[#allocation10 + $0xe0] sm:$0xff] }
  0x48   :  { %396 = vmatpush.msrb.mxu1 %v177_v6  ;;  %370 = vmatpush.msrb.mxu0 %v248_v27  ;;  %v195_v59 = vld [vmem:[#allocation10 + $0x1d8] sm:$0xff]  ;;  %v157_v60 = vld [vmem:[#allocation10 + $0xa8] sm:$0xff]  ;;  %v158_v61 = vld [vmem:[#allocation10 + $0xb0] sm:$0xff] }
  0x49   :  { %416 = vmatpush.msrb.mxu2 %v178_v8  ;;  %436 = vmatpush.msrb.mxu3 %v179_v9  ;;  %v152_v62 = vld [vmem:[#allocation10 + $0x80] sm:$0xff]  ;;  %v183_v63 = vld [vmem:[#allocation10 + $0x178] sm:$0xff]  ;;  %v145_v0 = vld [vmem:[#allocation10 + $0x48] sm:$0xff] }
  0x4a   :  { %397 = vmatpush.msrb.mxu1 %v165_v10  ;;  %371 = vmatpush.msrb.mxu0 %v236_v31  ;;  %v146_v1 = vld [vmem:[#allocation10 + $0x50] sm:$0xff]  ;;  %v140_v2 = vld [vmem:[#allocation10 + $0x20] sm:$0xff]  ;;  %v171_v3 = vld [vmem:[#allocation10 + $0x118] sm:$0xff] }
  0x4b   :  { %417 = vmatpush.msrb.mxu2 %v166_v12  ;;  %437 = vmatpush.msrb.mxu3 %v167_v13  ;;  %v276_v4 = vld [vmem:[#allocation10 + $0x460] sm:$0xff]  ;;  %v159_v5 = vld [vmem:[#allocation10 + $0xb8] sm:$0xff] }
  0x4c   :  { %398 = vmatpush.msrb.mxu1 %v153_v14  ;;  %372 = vmatpush.msrb.mxu0 %v224_v35  ;;  %v264_v6 = vld [vmem:[#allocation10 + $0x400] sm:$0xff]  ;;  %v147_v7 = vld [vmem:[#allocation10 + $0x58] sm:$0xff] }
  0x4d   :  { %418 = vmatpush.msrb.mxu2 %v154_v16  ;;  %438 = vmatpush.msrb.mxu3 %v155_v17  ;;  %v252_v8 = vld [vmem:[#allocation10 + $0x3a0] sm:$0xff] }
  0x4e   :  { %399 = vmatpush.msrb.mxu1 %v141_v18  ;;  %373 = vmatpush.msrb.mxu0 %v212_v38  ;;  %v240_v9 = vld [vmem:[#allocation10 + $0x340] sm:$0xff] }
  0x4f   :  { %419 = vmatpush.msrb.mxu2 %v142_v20  ;;  %439 = vmatpush.msrb.mxu3 %v143_v21  ;;  %v228_v10 = vld [vmem:[#allocation10 + $0x2e0] sm:$0xff] }
  0x50   :  { %848 = vmatmul.msk.f32.vlgmr.msra.gmra.mxu1 %vm280_vm0, %v1210_v48  ;;  %854 = vmatmul.msk.f32.vlgmr.msrb.gmra.mxu3 %vm280_vm0, %v1210_v48  ;;  %v216_v11 = vld [vmem:[#allocation10 + $0x280] sm:$0xff] }
  0x51   :  { %468 = vmatpush.msra.mxu1 %v277_v22  ;;  %488 = vmatpush.msra.mxu2 %v278_v23  ;;  %v204_v12 = vld [vmem:[#allocation10 + $0x220] sm:$0xff] }
  0x52   :  { %853 = vmatmul.msk.f32.vlgmr.msrb.gmra.mxu2 %vm280_vm0, %v1210_v48  ;;  %508 = vmatpush.msra.mxu3 %v279_v28  ;;  %v192_v13 = vld [vmem:[#allocation10 + $0x1c0] sm:$0xff] }
  0x53   :  { %469 = vmatpush.msra.mxu1 %v265_v25  ;;  %489 = vmatpush.msra.mxu2 %v266_v26  ;;  %v180_v14 = vld [vmem:[#allocation10 + $0x160] sm:$0xff] }
  0x54   :  { %509 = vmatpush.msra.mxu3 %v267_v32  ;;  %374 = vmatpush.msrb.mxu0 %v200_v42  ;;  %v168_v15 = vld [vmem:[#allocation10 + $0x100] sm:$0xff] }
  0x55   :  { %470 = vmatpush.msra.mxu1 %v253_v29  ;;  %490 = vmatpush.msra.mxu2 %v254_v30  ;;  %v156_v16 = vld [vmem:[#allocation10 + $0xa0] sm:$0xff] }
  0x56   :  { %510 = vmatpush.msra.mxu3 %v255_v39  ;;  %375 = vmatpush.msrb.mxu0 %v188_v46  ;;  %v144_v17 = vld [vmem:[#allocation10 + $0x40] sm:$0xff] }
  0x57   :  { %471 = vmatpush.msra.mxu1 %v241_v33  ;;  %491 = vmatpush.msra.mxu2 %v242_v34  ;;  %v1245_v32 = vld [vmem:[#allocation11] sm:$0x7] }
  0x58   :  { %852 = vmatmul.msk.f32.vlgmr.msrb.gmra.mxu1 %vm280_vm0, %v1210_v48  ;;  %511 = vmatpush.msra.mxu3 %v243_v43  ;;  %v537_v34 = vperm.slane %v1245_v32, 0  ;;  %v546_v46 = vld [vmem:[#allocation7] sm:$0xff] }
  0x59   :  { %472 = vmatpush.msra.mxu1 %v229_v36  ;;  %492 = vmatpush.msra.mxu2 %v230_v37 }
  0x5a   :  { %512 = vmatpush.msra.mxu3 %v231_v47  ;;  %847 = vmatmul.msk.f32.vlgmr.msra.gmra.mxu0 %vm280_vm0, %v1210_v48 }
  0x5b   :  { %473 = vmatpush.msra.mxu1 %v217_v40  ;;  %493 = vmatpush.msra.mxu2 %v218_v41 }
  0x5c   :  { %513 = vmatpush.msra.mxu3 %v219_v51  ;;  %376 = vmatpush.msrb.mxu0 %v176_v54 }
  0x5d   :  { %474 = vmatpush.msra.mxu1 %v205_v44  ;;  %494 = vmatpush.msra.mxu2 %v206_v45 }
  0x5e   :  { %514 = vmatpush.msra.mxu3 %v207_v55  ;;  %377 = vmatpush.msrb.mxu0 %v164_v58  ;;  %v538_v58 = vperm.slane %v1245_v32, 1 }
  0x5f   :  { %475 = vmatpush.msra.mxu1 %v193_v49  ;;  %495 = vmatpush.msra.mxu2 %v194_v50 }
  0x60   :  { %515 = vmatpush.msra.mxu3 %v195_v59  ;;  %378 = vmatpush.msrb.mxu0 %v152_v62  ;;  %v547_v62 = vld [vmem:[#allocation7 + $0x8] sm:$0xff] }
  0x61   :  { %476 = vmatpush.msra.mxu1 %v181_v52  ;;  %496 = vmatpush.msra.mxu2 %v182_v53 }
  0x62   :  { %516 = vmatpush.msra.mxu3 %v183_v63  ;;  %379 = vmatpush.msrb.mxu0 %v140_v2  ;;  %v676_v2 = vld [vmem:[#allocation13 + $0xf8] sm:$0xff] }
  0x63   :  { %477 = vmatpush.msra.mxu1 %v169_v56  ;;  %497 = vmatpush.msra.mxu2 %v170_v57 }
  0x64   :  { %517 = vmatpush.msra.mxu3 %v171_v3  ;;  %851 = vmatmul.msk.f32.vlgmr.msrb.gmra.mxu0 %vm280_vm0, %v1210_v48 }
  0x65   :  { %478 = vmatpush.msra.mxu1 %v157_v60  ;;  %498 = vmatpush.msra.mxu2 %v158_v61 }
  0x66   :  { %448 = vmatpush.msra.mxu0 %v276_v4  ;;  %518 = vmatpush.msra.mxu3 %v159_v5 }
  0x67   :  { %479 = vmatpush.msra.mxu1 %v145_v0  ;;  %499 = vmatpush.msra.mxu2 %v146_v1  ;;  %v675_v1 = vld [vmem:[#allocation13 + $0xf0] sm:$0xff] }
  0x68   :  { %856 = vmatmul.msk.f32.vlgmr.msra.gmra.mxu1 %vm280_vm0, %v1210_v48  ;;  %857 = vmatmul.msk.f32.vlgmr.msra.gmra.mxu2 %vm280_vm0, %v1210_v48 }
  0x69   :  { %449 = vmatpush.msra.mxu0 %v264_v6  ;;  %519 = vmatpush.msra.mxu3 %v147_v7  ;;  %v673_v6 = vld [vmem:[#allocation13 + $0xe0] sm:$0xff]  ;;  %v707_v7 = vld [vmem:[#allocation13 + $0x1f0] sm:$0xff] }
  0x6a   :  { %858 = vmatmul.msk.f32.vlgmr.msra.gmra.mxu3 %vm280_vm0, %v1210_v48  ;;  %749 = vmatpush.msrb.mxu2 %v676_v2 }
  0x6b   :  { %450 = vmatpush.msra.mxu0 %v252_v8  ;;  %v674_v8 = vld [vmem:[#allocation13 + $0xe8] sm:$0xff]  ;;  %729 = vmatpush.msrb.mxu1 %v707_v7  ;;  %v651_v7 = vld [vmem:[#allocation13 + $0x30] sm:$0xff] }
  0x6c   :  { %750 = vmatpush.msrb.mxu2 %v674_v8  ;;  %v685_v8 = vld [vmem:[#allocation13 + $0x140] sm:$0xff] }
  0x6d   :  { %451 = vmatpush.msra.mxu0 %v240_v9 }
  0x6f   :  { %452 = vmatpush.msra.mxu0 %v228_v10  ;;  %v708_v10 = vld [vmem:[#allocation13 + $0x1f8] sm:$0xff] }
  0x70   :  { %769 = vmatpush.msrb.mxu3 %v708_v10  ;;  %v686_v10 = vld [vmem:[#allocation13 + $0x148] sm:$0xff] }
  0x71   :  { %453 = vmatpush.msra.mxu0 %v216_v11 }
  0x73   :  { %454 = vmatpush.msra.mxu0 %v204_v12  ;;  %v671_v12 = vld [vmem:[#allocation13 + $0xd0] sm:$0xff] }
  0x75   :  { %455 = vmatpush.msra.mxu0 %v192_v13  ;;  %v705_v13 = vld [vmem:[#allocation13 + $0x1e0] sm:$0xff] }
  0x76   :  { %730 = vmatpush.msrb.mxu1 %v705_v13  ;;  %v649_v13 = vld [vmem:[#allocation13 + $0x20] sm:$0xff] }
  0x77   :  { %456 = vmatpush.msra.mxu0 %v180_v14  ;;  %v672_v14 = vld [vmem:[#allocation13 + $0xd8] sm:$0xff] }
  0x78   :  { %751 = vmatpush.msrb.mxu2 %v672_v14  ;;  %v683_v14 = vld [vmem:[#allocation13 + $0x130] sm:$0xff] }
  0x79   :  { %457 = vmatpush.msra.mxu0 %v168_v15  ;;  %v706_v15 = vld [vmem:[#allocation13 + $0x1e8] sm:$0xff] }
  0x7a   :  { %770 = vmatpush.msrb.mxu3 %v706_v15  ;;  %v650_v15 = vld [vmem:[#allocation13 + $0x28] sm:$0xff] }
  0x7b   :  { %458 = vmatpush.msra.mxu0 %v156_v16  ;;  %v669_v16 = vld [vmem:[#allocation13 + $0xc0] sm:$0xff] }
  0x7d   :  { %459 = vmatpush.msra.mxu0 %v144_v17  ;;  %v703_v17 = vld [vmem:[#allocation13 + $0x1d0] sm:$0xff] }
  0x7e   :  { %855 = vmatmul.msk.f32.vlgmr.msra.gmra.mxu0 %vm280_vm0, %v1210_v48  ;;  %v1243_v48 = vld [vmem:[%s1289_s5] sm:$0x7]  ;;  %731 = vmatpush.msrb.mxu1 %v703_v17  ;;  %s1132_s5 = smov [#allocation15]  }
  0x7f   :  { %v526_v33 = vperm.slane %v1243_v48, 0  ;;  %v527_v61 = vperm.slane %v1243_v48, 1  ;;  %709 = vmatpush.msrb.mxu0 %v675_v1  ;;  %v687_v1 = vld [vmem:[#allocation13 + $0x150] sm:$0xff]  ;;  %s827_s26 = sshll.u32 %s1132_s5, 4  ;;  %s828_s26 = int_to_ptr.vmem [resolvable:$true] %s827_s26 }
  0x81   :  { %710 = vmatpush.msrb.mxu0 %v673_v6 }
  0x83   :  { %711 = vmatpush.msrb.mxu0 %v671_v12 }
  0x85   :  { %712 = vmatpush.msrb.mxu0 %v669_v16  ;;  %v684_v16 = vld [vmem:[#allocation13 + $0x138] sm:$0xff] }
  0xbe   :  { %v1236_v19 = vpop.f32.mrf.mxu2 }
  0xbf   :  { %v361_v23 = vpop.f32.mrf.mxu3 }
  0xcd   :  { %v321_v18 = vpop.f32.mrf.mxu1 }
  0xce   :  { %v533_v4 = vadd.f32 %v527_v61, %v321_v18  ;;  %v670_v18 = vld [vmem:[#allocation13 + $0xc8] sm:$0xff] }
  0xcf   :  { %752 = vmatpush.msrb.mxu2 %v670_v18  ;;  %v690_v61 = vld [vmem:[#allocation13 + $0x168] sm:$0xff]  ;;  %v647_v18 = vld [vmem:[#allocation13 + $0x10] sm:$0xff] }
  0xd3   :  { %v441_v60 = vpop.f32.mrf.mxu3 }
  0xd4   :  { %v544_v0 = vadd.f32 %v538_v58, %v441_v60  ;;  %v689_v58 = vld [vmem:[#allocation13 + $0x160] sm:$0xff]  ;;  %v656_v60 = vld [vmem:[#allocation13 + $0x58] sm:$0xff] }
  0xd5   :  { %v1238_v20 = vpop.f32.mrf.mxu1  ;;  %v421_v22 = vpop.f32.mrf.mxu2 }
  0xd6   :  { %v543_v40 = vadd.f32 %v537_v34, %v421_v22  ;;  %v584_v11 = vadd.f32 %v544_v0, %v533_v4  ;;  %v704_v22 = vld [vmem:[#allocation13 + $0x1d8] sm:$0xff]  ;;  %v653_v0 = vld [vmem:[#allocation13 + $0x40] sm:$0xff]  ;;  %v654_v4 = vld [vmem:[#allocation13 + $0x48] sm:$0xff] }
  0xd7   :  { %v301_v21 = vpop.f32.mrf.mxu0  ;;  %771 = vmatpush.msrb.mxu3 %v704_v22  ;;  %v648_v22 = vld [vmem:[#allocation13 + $0x18] sm:$0xff] }
  0xd8   :  { %v532_v39 = vadd.f32 %v526_v33, %v301_v21 }
  0xda   :  { %v549_v47 = vadd.f32 %v543_v40, %v532_v39  ;;  %v661_v39 = vld [vmem:[#allocation13 + $0x80] sm:$0xff]  ;;  %v695_v40 = vld [vmem:[#allocation13 + $0x190] sm:$0xff] }
  0xe1   :  { %v381_v26 = vpop.f32.mrf.mxu0 }
  0xe5   :  { %v481_v24 = vpop.f32.mrf.mxu1 }
  0xe6   :  { %v550_v25 = vadd.f32 %v481_v24, %v361_v23  ;;  %v667_v23 = vld [vmem:[#allocation13 + $0xb0] sm:$0xff]  ;;  %v701_v24 = vld [vmem:[#allocation13 + $0x1c0] sm:$0xff] }
  0xe7   :  { %713 = vmatpush.msrb.mxu0 %v667_v23  ;;  %732 = vmatpush.msrb.mxu1 %v701_v24  ;;  %v682_v23 = vld [vmem:[#allocation13 + $0x128] sm:$0xff]  ;;  %v645_v24 = vld [vmem:[#allocation13] sm:$0xff] }
  0xe8   :  { %875 = vrsqrt.f32 %v550_v25  ;;  %vm558_vm1 = vcmp.eq.f32.partialorder %v550_v25, inf  ;;  %v561_v45 = vand.u32 2147483648, %v550_v25  ;;  %vm560_vm2 = vcmp.eq.f32.partialorder %v550_v25, 0.0 }
  0xeb   :  { %v501_v27 = vpop.f32.mrf.mxu2 }
  0xec   :  { %v585_v28 = vadd.f32 %v501_v27, %v381_v26  ;;  %v702_v26 = vld [vmem:[#allocation13 + $0x1c8] sm:$0xff]  ;;  %v665_v27 = vld [vmem:[#allocation13 + $0xa0] sm:$0xff] }
  0xed   :  { %772 = vmatpush.msrb.mxu3 %v702_v26  ;;  %714 = vmatpush.msrb.mxu0 %v665_v27  ;;  %v646_v26 = vld [vmem:[#allocation13 + $0x8] sm:$0xff]  ;;  %v680_v27 = vld [vmem:[#allocation13 + $0x118] sm:$0xff] }
  0xee   :  { %v876_v29 = vpop.eup %875  ;;  %877 = vrsqrt.f32 %v585_v28  ;;  %vm593_vm3 = vcmp.eq.f32.partialorder %v585_v28, inf  ;;  %v596_v57 = vand.u32 2147483648, %v585_v28  ;;  %vm595_vm4 = vcmp.eq.f32.partialorder %v585_v28, 0.0 }
  0xef   :  { %v552_v30 = vmul.f32 %v876_v29, %v550_v25 }
  0xf1   :  { %v553_v31 = vmul.f32 %v876_v29, %v552_v30  ;;  %v700_v30 = vld [vmem:[#allocation13 + $0x1b8] sm:$0xff] }
  0xf2   :  { %773 = vmatpush.msrb.mxu3 %v700_v30 }
  0xf3   :  { %v554_v35 = vmul.f32 0.5, %v553_v31  ;;  %v663_v31 = vld [vmem:[#allocation13 + $0x90] sm:$0xff] }
  0xf4   :  { %v878_v36 = vpop.eup %877  ;;  %715 = vmatpush.msrb.mxu0 %v663_v31 }
  0xf5   :  { %v555_v37 = vsub.f32 1.5, %v554_v35  ;;  %v587_v38 = vmul.f32 %v878_v36, %v585_v28  ;;  %v697_v35 = vld [vmem:[#allocation13 + $0x1a0] sm:$0xff] }
  0xf6   :  { %716 = vmatpush.msrb.mxu0 %v661_v39 }
  0xf7   :  { %v556_v41 = vmul.f32 %v876_v29, %v555_v37  ;;  %v588_v42 = vmul.f32 %v878_v36, %v587_v38  ;;  %v666_v29 = vld [vmem:[#allocation13 + $0xa8] sm:$0xff] }
  0xf8   :  { %v698_v37 = vld [vmem:[#allocation13 + $0x1a8] sm:$0xff] }
  0xf9   :  { %v557_v43 = vmul.f32 %v556_v41, %v550_v25  ;;  %v589_v44 = vmul.f32 0.5, %v588_v42  ;;  %v662_v41 = vld [vmem:[#allocation13 + $0x88] sm:$0xff]  ;;  %v696_v42 = vld [vmem:[#allocation13 + $0x198] sm:$0xff]  ;;  %774 = vmatpush.msrb.mxu3 %v698_v37 }
  0xfb   :  { %v559_v49 = vsel %vm558_vm1, %v550_v25, %v557_v43  ;;  %v590_v50 = vsub.f32 1.5, %v589_v44  ;;  %v668_v25 = vld [vmem:[#allocation13 + $0xb8] sm:$0xff]  ;;  %v659_v44 = vld [vmem:[#allocation13 + $0x70] sm:$0xff]  ;;  %775 = vmatpush.msrb.mxu3 %v696_v42 }
  0xfc   :  { %v562_v51 = vsel %vm560_vm2, %v561_v45, %v559_v49  ;;  %753 = vmatpush.msrb.mxu2 %v668_v25  ;;  %v693_v45 = vld [vmem:[#allocation13 + $0x180] sm:$0xff]  ;;  %v694_v49 = vld [vmem:[#allocation13 + $0x188] sm:$0xff]  ;;  %717 = vmatpush.msrb.mxu0 %v659_v44  ;;  %v679_v25 = vld [vmem:[#allocation13 + $0x110] sm:$0xff] }
  0xfd   :  { %v591_v52 = vmul.f32 %v878_v36, %v590_v50  ;;  %v563_v53 = vmul.f32 %v562_v51, %v546_v46  ;;  %v664_v36 = vld [vmem:[#allocation13 + $0x98] sm:$0xff]  ;;  %776 = vmatpush.msrb.mxu3 %v694_v49 }
  0xfe   :  { %754 = vmatpush.msrb.mxu2 %v666_v29 }
  0xff   :  { %v592_v54 = vmul.f32 %v591_v52, %v585_v28  ;;  %v564_v55 = vadd.f32 %v563_v53, %v549_v47  ;;  %v660_v47 = vld [vmem:[#allocation13 + $0x78] sm:$0xff]  ;;  %v657_v52 = vld [vmem:[#allocation13 + $0x60] sm:$0xff]  ;;  %v691_v53 = vld [vmem:[#allocation13 + $0x170] sm:$0xff] }
 0x100   :  { %755 = vmatpush.msrb.mxu2 %v664_v36  ;;  %718 = vmatpush.msrb.mxu0 %v657_v52  ;;  %v461_v36 = vpop.f32.mrf.mxu0 }
 0x101   :  { %v859_v56 = vmul.f32 -1.442695, %v564_v55  ;;  %v594_v59 = vsel %vm593_vm3, %v585_v28, %v592_v54  ;;  %v699_v28 = vld [vmem:[#allocation13 + $0x1b0] sm:$0xff]  ;;  %v658_v54 = vld [vmem:[#allocation13 + $0x68] sm:$0xff]  ;;  %v692_v55 = vld [vmem:[#allocation13 + $0x178] sm:$0xff] }
 0x102   :  { %v597_v63 = vsel %vm595_vm4, %v596_v57, %v594_v59  ;;  %733 = vmatpush.msrb.mxu1 %v699_v28  ;;  %756 = vmatpush.msrb.mxu2 %v662_v41  ;;  %v655_v57 = vld [vmem:[#allocation13 + $0x50] sm:$0xff]  ;;  %v678_v28 = vld [vmem:[#allocation13 + $0x108] sm:$0xff]  ;;  %v528_v41 = vperm.slane %v1243_v48, 2 }
 0x103   :  { %879 = vpow2.f32 %v859_v56  ;;  %v598_v5 = vmul.f32 %v597_v63, %v547_v62  ;;  %777 = vmatpush.msrb.mxu3 %v692_v55  ;;  %719 = vmatpush.msrb.mxu0 %v655_v57 }
 0x104   :  { %734 = vmatpush.msrb.mxu1 %v697_v35  ;;  %757 = vmatpush.msrb.mxu2 %v660_v47  ;;  %v534_v49 = vadd.f32 %v528_v41, %v1236_v19 }
 0x105   :  { %v599_v21 = vadd.f32 %v598_v5, %v584_v11  ;;  %v688_v5 = vld [vmem:[#allocation13 + $0x158] sm:$0xff]  ;;  %778 = vmatpush.msrb.mxu3 %v690_v61  ;;  %720 = vmatpush.msrb.mxu0 %v653_v0 }
 0x106   :  { %735 = vmatpush.msrb.mxu1 %v695_v40  ;;  %758 = vmatpush.msrb.mxu2 %v658_v54 }
 0x107   :  { %v860_v33 = vmul.f32 -1.442695, %v599_v21  ;;  %779 = vmatpush.msrb.mxu3 %v688_v5  ;;  %721 = vmatpush.msrb.mxu0 %v651_v7  ;;  %v681_v21 = vld [vmem:[#allocation13 + $0x120] sm:$0xff] }
 0x108   :  { %736 = vmatpush.msrb.mxu1 %v693_v45  ;;  %759 = vmatpush.msrb.mxu2 %v656_v60 }
 0x109   :  { %v880_v3 = vpop.eup %879  ;;  %780 = vmatpush.msrb.mxu3 %v686_v10  ;;  %722 = vmatpush.msrb.mxu0 %v649_v13  ;;  %v874_v13 = vld [vmem:[%s1292_s8] ss:$0 sm:$0xff] }
 0x10a   :  { %v1251_v9 = vadd.f32 1.0, %v880_v3  ;;  %737 = vmatpush.msrb.mxu1 %v691_v53  ;;  %v521_v3 = vpop.f32.mrf.mxu3  ;;  %760 = vmatpush.msrb.mxu2 %v654_v4 }
 0x10b   :  { %781 = vmatpush.msrb.mxu3 %v684_v16  ;;  %723 = vmatpush.msrb.mxu0 %v647_v18  ;;  %v806_v16 = vld [vmem:[#allocation8] sm:$0xff] }
 0x10c   :  { %881 = vrcp.f32 %v1251_v9  ;;  %v580_v46 = vand.u32 2147483648, %v1251_v9  ;;  %v578_v51 = vand.u32 2147483647, %v1251_v9  ;;  %vm574_vm6 = vweird.f32 %v1251_v9  ;;  %738 = vmatpush.msrb.mxu1 %v689_v58  ;;  %v641_v58 = vld [vmem:[#allocation5] sm:$0xff] }
 0x10d   :  { %883 = vpow2.f32 %v860_v33  ;;  %782 = vmatpush.msrb.mxu3 %v682_v23  ;;  %724 = vmatpush.msrb.mxu0 %v645_v24 }
 0x10e   :  { %v581_v59 = vor.u32 1.1754944e-38, %v580_v46  ;;  %vm579_vm8 = vcmp.eq.f32.partialorder %v578_v51, 8.507059e+37  ;;  %739 = vmatpush.msrb.mxu1 %v687_v1  ;;  %v548_v46 = vld [vmem:[#allocation7 + $0x10] sm:$0xff] }
 0x10f   :  { %783 = vmatpush.msrb.mxu3 %v680_v27 }
 0x110   :  { %740 = vmatpush.msrb.mxu1 %v685_v8 }
 0x111   :  { %784 = vmatpush.msrb.mxu3 %v678_v28 }
 0x112   :  { %v882_v34 = vpop.eup %881  ;;  %741 = vmatpush.msrb.mxu1 %v683_v14 }
 0x113   :  { %v570_v38 = vmul.f32 %v882_v34, %v1251_v9  ;;  %vm575_vm5 = vweird.f32 %v882_v34  ;;  %v884_v62 = vpop.eup %883  ;;  %v652_v9 = vld [vmem:[#allocation13 + $0x38] sm:$0xff] }
 0x114   :  { %vm576_vm7 = vmor %vm574_vm6, %vm575_vm5  ;;  %v1263_v11 = vadd.f32 1.0, %v884_v62  ;;  %761 = vmatpush.msrb.mxu2 %v652_v9  ;;  %742 = vmatpush.msrb.mxu1 %v681_v21 }
 0x115   :  { %v571_v43 = vsub.f32 1.0, %v570_v38 }
 0x116   :  { %885 = vrcp.f32 %v1263_v11  ;;  %762 = vmatpush.msrb.mxu2 %v650_v15  ;;  %743 = vmatpush.msrb.mxu1 %v679_v25  ;;  %v615_v53 = vand.u32 2147483648, %v1263_v11  ;;  %vm609_vm12 = vweird.f32 %v1263_v11  ;;  %v613_v48 = vand.u32 2147483647, %v1263_v11 }
 0x117   :  { %v572_v50 = vmul.f32 %v882_v34, %v571_v43 }
 0x118   :  { %763 = vmatpush.msrb.mxu2 %v648_v22  ;;  %v616_v57 = vor.u32 1.1754944e-38, %v615_v53  ;;  %vm614_vm14 = vcmp.eq.f32.partialorder %v613_v48, 8.507059e+37 }
 0x119   :  { %v573_v56 = vadd.f32 %v882_v34, %v572_v50 }
 0x11a   :  { %764 = vmatpush.msrb.mxu2 %v646_v26 }
 0x11b   :  { %v577_v63 = vsel %vm576_vm7, %v882_v34, %v573_v56  ;;  %v539_v34 = vperm.slane %v1245_v32, 2 }
 0x11c   :  { %v1259_v2 = vsel %vm579_vm8, %v581_v59, %v577_v63  ;;  %v886_v29 = vpop.eup %885 }
 0x11d   :  { %v621_v6 = vmul.f32 %v1259_v2, %v1259_v2  ;;  %v605_v33 = vmul.f32 %v886_v29, %v1263_v11  ;;  %v545_v39 = vadd.f32 %v539_v34, %v461_v36  ;;  %vm610_vm11 = vweird.f32 %v886_v29 }
 0x11e   :  { %vm611_vm13 = vmor %vm609_vm12, %vm610_vm11 }
 0x11f   :  { %v622_v12 = vmul.f32 %v621_v6, %v521_v3  ;;  %v606_v38 = vsub.f32 1.0, %v605_v33  ;;  %v619_v44 = vmul.f32 %v1259_v2, %v545_v39 }
 0x121   :  { %v623_v17 = vadd.f32 %v622_v12, %v1238_v20  ;;  %v677_v20 = vld [vmem:[#allocation13 + $0x100] sm:$0xff]  ;;  %v607_v43 = vmul.f32 %v886_v29, %v606_v38  ;;  %v620_v52 = vadd.f32 %v619_v44, %v534_v49 }
 0x122   :  { %744 = vmatpush.msrb.mxu1 %v677_v20 }
 0x123   :  { %887 = vrsqrt.f32 %v623_v17  ;;  %vm631_vm9 = vcmp.eq.f32.partialorder %v623_v17, inf  ;;  %v634_v47 = vand.u32 2147483648, %v623_v17  ;;  %vm633_vm10 = vcmp.eq.f32.partialorder %v623_v17, 0.0 }
 0x124   :  { %v608_v32 = vadd.f32 %v886_v29, %v607_v43 }
 0x126   :  { %v612_v56 = vsel %vm611_vm13, %v886_v29, %v608_v32 }
 0x127   :  { %v617_v19 = vsel %vm614_vm14, %v616_v57, %v612_v56 }
 0x128   :  { %v639_v59 = vsub.f32 1.0, %v617_v19  ;;  %v642_v62 = vmul.f32 %v641_v58, %v617_v19 }
 0x129   :  { %v888_v30 = vpop.eup %887 }
 0x12a   :  { %v625_v31 = vmul.f32 %v888_v30, %v623_v17 }
 0x12c   :  { %v626_v35 = vmul.f32 %v888_v30, %v625_v31 }
 0x12e   :  { %v627_v37 = vmul.f32 0.5, %v626_v35 }
 0x130   :  { %v628_v40 = vsub.f32 1.5, %v627_v37 }
 0x132   :  { %v629_v42 = vmul.f32 %v888_v30, %v628_v40 }
 0x134   :  { %v630_v45 = vmul.f32 %v629_v42, %v623_v17 }
 0x136   :  { %v632_v50 = vsel %vm631_vm9, %v623_v17, %v630_v45 }
 0x137   :  { %v635_v51 = vsel %vm633_vm10, %v634_v47, %v632_v50 }
 0x138   :  { %v636_v54 = vmul.f32 %v635_v51, %v548_v46 }
 0x13a   :  { %v637_v55 = vadd.f32 %v636_v54, %v620_v52 }
 0x13c   :  { %889 = vtanh.f32 %v637_v55 }
 0x142   :  { %v890_v60 = vpop.eup %889 }
 0x143   :  { %v640_v61 = vmul.f32 %v890_v60, %v639_v59 }
 0x145   :  { %v643_v63 = vadd.f32 %v642_v62, %v640_v61 }
 0x147   :  { %725 = vmatmul.f32.vlgmr.msrb.gmra.mxu0 %v643_v63  ;;  %810 = vst [vmem:[#allocation15] sm:$0xff] %v643_v63  ;;  %765 = vmatmul.f32.vlgmr.msrb.gmra.mxu2 %v643_v63  ;;  %v644_v0 = vmul.f32 %v643_v63, %v643_v63 }
 0x148   :  { %832 = dma.vmem_to_hbm [thread:$0]  %s828_s26, 128, %s830_s29, [#allocation16]  }
 0x149   :  { %745 = vmatmul.f32.vlgmr.msrb.gmra.mxu1 %v644_v0  ;;  %785 = vmatmul.f32.vlgmr.msrb.gmra.mxu3 %v644_v0 }
 0x1c4   :  { %v726_v11 = vpop.f32.mrf.mxu0 }
 0x1c6   :  { %v746_v9 = vpop.f32.mrf.mxu1 }
 0x1c7   :  { %v747_v12 = vadd.f32 %v746_v9, %v726_v11 }
 0x1c9   :  { %v793_v21 = vadd.f32 %v874_v13, %v747_v12 }
 0x1ca   :  { %v766_v1 = vpop.f32.mrf.mxu2 }
 0x1cc   :  { %v786_v2 = vpop.f32.mrf.mxu3 }
 0x1cd   :  { %v787_v3 = vadd.f32 %v786_v2, %v766_v1 }
 0x1cf   :  { %891 = vrsqrt.f32 %v787_v3  ;;  %vm801_vm15 = vcmp.eq.f32.partialorder %v787_v3, inf  ;;  %v804_v15 = vand.u32 2147483648, %v787_v3  ;;  %vm803_vm0 = vcmp.eq.f32.partialorder %v787_v3, 0.0 }
 0x1d5   :  { %v892_v4 = vpop.eup %891 }
 0x1d6   :  { %v795_v5 = vmul.f32 %v892_v4, %v787_v3 }
 0x1d8   :  { %v796_v6 = vmul.f32 %v892_v4, %v795_v5 }
 0x1da   :  { %v797_v7 = vmul.f32 0.5, %v796_v6 }
 0x1dc   :  { %v798_v8 = vsub.f32 1.5, %v797_v7 }
 0x1de   :  { %v799_v10 = vmul.f32 %v892_v4, %v798_v8 }
 0x1e0   :  { %v800_v14 = vmul.f32 %v799_v10, %v787_v3 }
 0x1e2   :  { %v802_v17 = vsel %vm801_vm15, %v787_v3, %v800_v14 }
 0x1e3   :  { %v805_v18 = vsel %vm803_vm0, %v804_v15, %v802_v17 }
 0x1e4   :  { %v807_v22 = vmul.f32 %v806_v16, %v805_v18 }
 0x1e6   :  { %v808_v23 = vadd.f32 %v807_v22, %v793_v21 }
 0x1e8   :  { %809 = vst [vmem:[#allocation14] sm:$0xff] %v808_v23 }
 0x1e9   :  { %821 = dma.vmem_to_hbm [thread:$0]  %s817_s11, 128, %s819_s6, [#allocation4]  }
 0x1ea   :  { %1117 = dma.done.wait [#allocation4], 128  }
 0x1eb   :  { %1118 = vsyncadd [#allocation4], 4294967168 }
 0x1ec   :  { %1119 = dma.done.wait [#allocation16], 128  }
 0x1ed   :  { %1120 = vsyncadd [#allocation16], 4294967168 }
 0x1ee   :  { %841 = vsyncpa [#allocation3], 1 }
 0x1ef   :  { %842 = vsyncpa [#allocation6], 1 }
 0x1f0   :  { %843 = vsyncpa [#allocation9], 1 }
 0x1f1   :  { %844 = vsyncpa [#allocation12], 1 }
 0x1f2   :  { %845 = vsyncpa [#allocation4], 1 }
 0x1f3   :  { %846 = vsyncpa [#allocation16], 1 }

</bundles_post_ra>
